<compile_context>
chip_gen: v6e
topology: v6e:2x2x1
jax: 0.10.0
libtpu: 0.0.40
codegen_flags: <defaults>
</compile_context>

<pallas_src>
import functools

import jax
import jax.numpy as jnp
from jax.experimental import pallas as pl
from jax.experimental.pallas import tpu as pltpu

_SUBLANE = 8
_MIN_SPLIT_ROWS = 1024   # per-core row floor before splitting one tile across 2 TCs


def _cdiv(a, b):
    return (a + b - 1) // b


def _round_up(a, b):
    return _cdiv(a, b) * b


def _num_tensorcores():
    """Import-time (static) TensorCore count per Pallas device.

    Only used as a perf heuristic: splitting a single batch tile across a
    'parallel' grid axis is a win on 2-TC chips (v7x) and pure serial-loop
    overhead on 1-TC chips (v5e/v6e). Falls back to 1 on any query failure.
    """
    try:
        info = pltpu.get_tpu_info()
        for attr in ("num_cores", "num_tensorcores", "tensorcore_count",
                     "cores_per_chip", "num_cores_per_chip"):
            v = getattr(info, attr, None)
            if v is not None:
                try:
                    v = int(v)
                except (TypeError, ValueError):
                    continue
                if v >= 1:
                    return v
    except Exception:
        pass
    try:
        kind = jax.devices()[0].device_kind.lower()
        if "v7" in kind or "7x" in kind:
            return 2
    except Exception:
        pass
    return 1


_NUM_TC = _num_tensorcores()


def _actor_kernel(x_ref, w1_ref, b1_ref, w2_ref, b2_ref, w3_ref, b3_ref,
                  lim_ref, out_ref):
    """Fused 3-layer MLP forward for one batch tile, entirely in VMEM."""
    x = x_ref[...]

    # linear1 + ReLU
    h1 = jnp.dot(x, w1_ref[...], preferred_element_type=jnp.float32) + b1_ref[...]
    h1 = jnp.maximum(h1, 0.0)

    # linear2 + ReLU
    h2 = jnp.dot(h1, w2_ref[...], preferred_element_type=jnp.float32) + b2_ref[...]
    h2 = jnp.maximum(h2, 0.0)

    # linear3 (the "model" head), then sigmoid * action_lim_high.
    m = jnp.dot(h2, w3_ref[...], preferred_element_type=jnp.float32) + b3_ref[...]
    out_ref[...] = (jax.nn.sigmoid(m) * lim_ref[...]).astype(out_ref.dtype)


def _dense_forward(state, params, action_lim_high):
    """Pure-XLA forward — used as the small-batch fast path."""
    h1 = jnp.maximum(state @ params["w1"] + params["b1"], 0.0)
    h2 = jnp.maximum(h1 @ params["w2"] + params["b2"], 0.0)
    m = h2 @ params["w3"] + params["b3"]
    return jax.nn.sigmoid(m) * action_lim_high


@functools.partial(jax.jit, static_argnames=("batch_tile", "min_pallas_batch"))
def actor_net_forward(state, params, action_lim_high, *,
                      batch_tile=2048, min_pallas_batch=512):
    """Pallas-backed ActorNet.forward(state).

    state:           [B, num_inputs] float32
    params:          dict of w1 [I,H], b1 [1,H], w2 [H,H], b2 [1,H],
                              w3 [H,A], b3 [1,A]   (weights pre-transposed vs PyTorch)
    action_lim_high: [1, A] float32
    returns:         [B, A] float32
    """
    B, num_inputs = state.shape
    H = params["w1"].shape[1]
    A = params["w3"].shape[1]

    # ---- small-batch fast path (custom-call dispatch would dominate) ----------
    if B < min_pallas_batch:
        return _dense_forward(state, params, action_lim_high)

    # ---- static tiling decisions (all shapes known at trace time) -------------
    b8 = _round_up(B, _SUBLANE)
    n_tiles = _cdiv(b8, batch_tile)
    if _NUM_TC >= 2 and n_tiles == 1 and b8 >= 2 * _MIN_SPLIT_ROWS:
        # Split one tile across v7x's 2 TensorCores, but only when each half is
        # big enough that the fixed per-step cost stays amortized.
        n_tiles = 2
    tile = _round_up(_cdiv(b8, n_tiles), _SUBLANE)
    B_pad = tile * n_tiles
    grid = (n_tiles,)

    # ---- pad only the ragged batch (no weight / action-dim padding needed) ----
    state_p = state if B_pad == B else jnp.pad(state, ((0, B_pad - B), (0, 0)))

    # Weights / biases / limits are tiny and have constant index_maps, so Pallas
    # fetches them once across the whole grid.
    const = lambda shape: pl.BlockSpec(shape, lambda i: (0, 0))

    out = pl.pallas_call(
        _actor_kernel,
        out_shape=jax.ShapeDtypeStruct((B_pad, A), jnp.float32),
        grid=grid,
        in_specs=[
            pl.BlockSpec((tile, num_inputs), lambda i: (i, 0)),  # state tile
            const((num_inputs, H)),   # w1
            const((1, H)),            # b1
            const((H, H)),            # w2
            const((1, H)),            # b2
            const((H, A)),            # w3
            const((1, A)),            # b3
            const((1, A)),            # action_lim_high
        ],
        out_specs=pl.BlockSpec((tile, A), lambda i: (i, 0)),
        compiler_params=pltpu.CompilerParams(
            dimension_semantics=("parallel",),
            vmem_limit_bytes=32 * 1024 * 1024),
    )(state_p, params["w1"], params["b1"], params["w2"], params["b2"],
      params["w3"], params["b3"], action_lim_high)

    return out if B_pad == B else out[:B]


def init_actor_params(key, num_inputs, num_actions, hidden_size=32, init_w=0.003):
    """Deterministic init mirroring nn.Linear defaults + the uniform(-init_w, init_w)
    override on linear3 (weights stored as [in, out])."""
    k1, k2, k3, k4, k5, k6 = jax.random.split(key, 6)

    def uniform(k, shape, bound):
        return jax.random.uniform(k, shape, jnp.float32, -bound, bound)

    bound1 = 1.0 / float(jnp.sqrt(num_inputs))
    bound2 = 1.0 / float(jnp.sqrt(hidden_size))
    return {
        "w1": uniform(k1, (num_inputs, hidden_size), bound1),
        "b1": uniform(k2, (1, hidden_size), bound1),
        "w2": uniform(k3, (hidden_size, hidden_size), bound2),
        "b2": uniform(k4, (1, hidden_size), bound2),
        "w3": uniform(k5, (hidden_size, num_actions), init_w),
        "b3": uniform(k6, (1, num_actions), init_w),
    }


def actor_net_reference(state, params, action_lim_high):
    """Pure-JAX reference for correctness check."""
    h1 = jnp.maximum(state @ params["w1"] + params["b1"], 0.0)
    h2 = jnp.maximum(h1 @ params["w2"] + params["b2"], 0.0)
    m = h2 @ params["w3"] + params["b3"]
    return jax.nn.sigmoid(m) * action_lim_high


if __name__ == "__main__":
    key = jax.random.PRNGKey(0)
    k_param, k_lim, *k_states = jax.random.split(key, 8)

    # Small shapes consistent with the module: num_inputs=16, hidden_size=32,
    # num_actions=8.
    num_inputs, hidden_size, num_actions = 16, 32, 8

    params = init_actor_params(k_param, num_inputs, num_actions, hidden_size)
    # action_lim.high (e.g. gym Box.high) -> deterministic positive limits.
    action_lim_high = jax.random.uniform(
        k_lim, (1, num_actions), jnp.float32, 1.0, 10.0)

    # (batch, forward kwargs) — the first three force the Pallas path so the kernel
    # itself is validated (tiny batch, ragged batch + padding, multi-tile grid);
    # the last uses the default config (large batch -> Pallas; 2-way split on v7x).
    cases = [
        (8, dict(min_pallas_batch=0)),
        (50, dict(min_pallas_batch=0)),
        (96, dict(min_pallas_batch=0, batch_tile=32)),
        (2048, dict()),
    ]
    for idx, (B, kwargs) in enumerate(cases):
        state = jax.random.normal(k_states[idx], (B, num_inputs), jnp.float32)
        out = jax.block_until_ready(
            actor_net_forward(state, params, action_lim_high, **kwargs))
        ref = actor_net_reference(state, params, action_lim_high)
        assert out.shape == (B, num_actions), (out.shape, B)
        assert jnp.allclose(out, ref, atol=1e-5, rtol=1e-5), f"mismatch (B={B})"

    # Small-batch fast path (default threshold -> pure-XLA dot chain).
    state_fp = jax.random.normal(k_states[4], (8, num_inputs), jnp.float32)
    out_fp = jax.block_until_ready(
        actor_net_forward(state_fp, params, action_lim_high))
    ref_fp = actor_net_reference(state_fp, params, action_lim_high)
    assert out_fp.shape == (8, num_actions)
    assert jnp.allclose(out_fp, ref_fp, atol=1e-5, rtol=1e-5), "mismatch (fast path)"

    print("KERNEL_OK")
</pallas_src>

<mosaic_0001>
module attributes {stable_mosaic.version = 11 : i64} {
  func.func @_actor_kernel(%arg0: i32, %arg1: memref<8x16xf32, #tpu.memory_space<vmem>>, %arg2: memref<16x32xf32, #tpu.memory_space<vmem>>, %arg3: memref<1x32xf32, #tpu.memory_space<vmem>>, %arg4: memref<32x32xf32, #tpu.memory_space<vmem>>, %arg5: memref<1x32xf32, #tpu.memory_space<vmem>>, %arg6: memref<32x8xf32, #tpu.memory_space<vmem>>, %arg7: memref<1x8xf32, #tpu.memory_space<vmem>>, %arg8: memref<1x8xf32, #tpu.memory_space<vmem>>, %arg9: memref<8x8xf32, #tpu.memory_space<vmem>>) attributes {dimension_semantics = [#tpu.dimension_semantics<parallel>], iteration_bounds = array<i64: 1>, scalar_prefetch = 0 : i64, scratch_operands = 0 : i64, tpu.core_type = #tpu.core_type<tc>, window_params = [{transform_indices = @transform_0, window_bounds = array<i64: 8, 16>}, {pipeline_mode = #tpu.pipeline_mode<synchronous>, transform_indices = @transform_1, window_bounds = array<i64: 16, 32>}, {pipeline_mode = #tpu.pipeline_mode<synchronous>, transform_indices = @transform_2, window_bounds = array<i64: 1, 32>}, {pipeline_mode = #tpu.pipeline_mode<synchronous>, transform_indices = @transform_3, window_bounds = array<i64: 32, 32>}, {pipeline_mode = #tpu.pipeline_mode<synchronous>, transform_indices = @transform_4, window_bounds = array<i64: 1, 32>}, {pipeline_mode = #tpu.pipeline_mode<synchronous>, transform_indices = @transform_5, window_bounds = array<i64: 32, 8>}, {pipeline_mode = #tpu.pipeline_mode<synchronous>, transform_indices = @transform_6, window_bounds = array<i64: 1, 8>}, {pipeline_mode = #tpu.pipeline_mode<synchronous>, transform_indices = @transform_7, window_bounds = array<i64: 1, 8>}, {transform_indices = @transform_8, window_bounds = array<i64: 8, 8>}]} {
    %c0 = arith.constant 0 : index
    %c0_0 = arith.constant 0 : index
    %0 = vector.load %arg1[%c0, %c0_0] : memref<8x16xf32, #tpu.memory_space<vmem>>, vector<8x16xf32>
    %c0_1 = arith.constant 0 : index
    %c0_2 = arith.constant 0 : index
    %1 = vector.load %arg2[%c0_1, %c0_2] : memref<16x32xf32, #tpu.memory_space<vmem>>, vector<16x32xf32>
    %cst = arith.constant dense<0.000000e+00> : vector<8x32xf32>
    %2 = tpu.matmul %0, %1, %cst {dimension_numbers = #tpu.dot_dimension_numbers<[1], [0], [0], [1], [0, 0, 1, 1], [], []>} : vector<8x16xf32>, vector<16x32xf32>, vector<8x32xf32> -> vector<8x32xf32>
    %c0_3 = arith.constant 0 : index
    %c0_4 = arith.constant 0 : index
    %3 = vector.load %arg3[%c0_3, %c0_4] : memref<1x32xf32, #tpu.memory_space<vmem>>, vector<1x32xf32>
    %4 = vector.broadcast %3 : vector<1x32xf32> to vector<8x32xf32>
    %5 = arith.addf %2, %4 : vector<8x32xf32>
    %cst_5 = arith.constant 0.000000e+00 : f32
    %6 = vector.broadcast %cst_5 : f32 to vector<8x32xf32>
    %7 = arith.maximumf %5, %6 : vector<8x32xf32>
    %c0_6 = arith.constant 0 : index
    %c0_7 = arith.constant 0 : index
    %8 = vector.load %arg4[%c0_6, %c0_7] : memref<32x32xf32, #tpu.memory_space<vmem>>, vector<32x32xf32>
    %cst_8 = arith.constant dense<0.000000e+00> : vector<8x32xf32>
    %9 = tpu.matmul %7, %8, %cst_8 {dimension_numbers = #tpu.dot_dimension_numbers<[1], [0], [0], [1], [0, 0, 1, 1], [], []>} : vector<8x32xf32>, vector<32x32xf32>, vector<8x32xf32> -> vector<8x32xf32>
    %c0_9 = arith.constant 0 : index
    %c0_10 = arith.constant 0 : index
    %10 = vector.load %arg5[%c0_9, %c0_10] : memref<1x32xf32, #tpu.memory_space<vmem>>, vector<1x32xf32>
    %11 = vector.broadcast %10 : vector<1x32xf32> to vector<8x32xf32>
    %12 = arith.addf %9, %11 : vector<8x32xf32>
    %cst_11 = arith.constant 0.000000e+00 : f32
    %13 = vector.broadcast %cst_11 : f32 to vector<8x32xf32>
    %14 = arith.maximumf %12, %13 : vector<8x32xf32>
    %c0_12 = arith.constant 0 : index
    %c0_13 = arith.constant 0 : index
    %15 = vector.load %arg6[%c0_12, %c0_13] : memref<32x8xf32, #tpu.memory_space<vmem>>, vector<32x8xf32>
    %cst_14 = arith.constant dense<0.000000e+00> : vector<8x8xf32>
    %16 = tpu.matmul %14, %15, %cst_14 {dimension_numbers = #tpu.dot_dimension_numbers<[1], [0], [0], [1], [0, 0, 1, 1], [], []>} : vector<8x32xf32>, vector<32x8xf32>, vector<8x8xf32> -> vector<8x8xf32>
    %c0_15 = arith.constant 0 : index
    %c0_16 = arith.constant 0 : index
    %17 = vector.load %arg7[%c0_15, %c0_16] : memref<1x8xf32, #tpu.memory_space<vmem>>, vector<1x8xf32>
    %18 = vector.broadcast %17 : vector<1x8xf32> to vector<8x8xf32>
    %19 = arith.addf %16, %18 : vector<8x8xf32>
    %20 = arith.negf %19 : vector<8x8xf32>
    %21 = math.exp %20 : vector<8x8xf32>
    %cst_17 = arith.constant 1.000000e+00 : f32
    %22 = vector.broadcast %cst_17 : f32 to vector<8x8xf32>
    %23 = arith.addf %22, %21 : vector<8x8xf32>
    %24 = arith.divf %22, %23 : vector<8x8xf32>
    %c0_18 = arith.constant 0 : index
    %c0_19 = arith.constant 0 : index
    %25 = vector.load %arg8[%c0_18, %c0_19] : memref<1x8xf32, #tpu.memory_space<vmem>>, vector<1x8xf32>
    %26 = vector.broadcast %25 : vector<1x8xf32> to vector<8x8xf32>
    %27 = arith.mulf %24, %26 : vector<8x8xf32>
    %c0_20 = arith.constant 0 : index
    %c0_21 = arith.constant 0 : index
    %28 = vector.load %arg9[%c0_20, %c0_21] : memref<8x8xf32, #tpu.memory_space<vmem>>, vector<8x8xf32>
    tpu.vector_store %arg9[%c0_20, %c0_21], %27 {strides = array<i32>} : memref<8x8xf32, #tpu.memory_space<vmem>>, vector<8x8xf32>,
    return
  }
  func.func @transform_0(%arg0: i32) -> (i32, i32) {
    %c0_i32 = arith.constant 0 : i32
    %c0_i32_0 = arith.constant 0 : i32
    return %arg0, %c0_i32 : i32, i32
  }
  func.func @transform_1(%arg0: i32) -> (i32, i32) {
    %c0_i32 = arith.constant 0 : i32
    %c0_i32_0 = arith.constant 0 : i32
    %c0_i32_1 = arith.constant 0 : i32
    return %c0_i32, %c0_i32_0 : i32, i32
  }
  func.func @transform_2(%arg0: i32) -> (i32, i32) {
    %c0_i32 = arith.constant 0 : i32
    %c0_i32_0 = arith.constant 0 : i32
    %c0_i32_1 = arith.constant 0 : i32
    return %c0_i32, %c0_i32_0 : i32, i32
  }
  func.func @transform_3(%arg0: i32) -> (i32, i32) {
    %c0_i32 = arith.constant 0 : i32
    %c0_i32_0 = arith.constant 0 : i32
    %c0_i32_1 = arith.constant 0 : i32
    return %c0_i32, %c0_i32_0 : i32, i32
  }
  func.func @transform_4(%arg0: i32) -> (i32, i32) {
    %c0_i32 = arith.constant 0 : i32
    %c0_i32_0 = arith.constant 0 : i32
    %c0_i32_1 = arith.constant 0 : i32
    return %c0_i32, %c0_i32_0 : i32, i32
  }
  func.func @transform_5(%arg0: i32) -> (i32, i32) {
    %c0_i32 = arith.constant 0 : i32
    %c0_i32_0 = arith.constant 0 : i32
    %c0_i32_1 = arith.constant 0 : i32
    return %c0_i32, %c0_i32_0 : i32, i32
  }
  func.func @transform_6(%arg0: i32) -> (i32, i32) {
    %c0_i32 = arith.constant 0 : i32
    %c0_i32_0 = arith.constant 0 : i32
    %c0_i32_1 = arith.constant 0 : i32
    return %c0_i32, %c0_i32_0 : i32, i32
  }
  func.func @transform_7(%arg0: i32) -> (i32, i32) {
    %c0_i32 = arith.constant 0 : i32
    %c0_i32_0 = arith.constant 0 : i32
    %c0_i32_1 = arith.constant 0 : i32
    return %c0_i32, %c0_i32_0 : i32, i32
  }
  func.func @transform_8(%arg0: i32) -> (i32, i32) {
    %c0_i32 = arith.constant 0 : i32
    %c0_i32_0 = arith.constant 0 : i32
    return %arg0, %c0_i32 : i32, i32
  }
}

</mosaic_0001>

<bundles_post_ra>
// kernel: actor_net_forward.1
= control target key start
LH: loop header
LB: loop body
LE: loop exit
PB: predicated region body
PF: predicated region fallthrough
CT: control target
= control target key end

     0   :  { %13 = vsyncpa [#allocation3], 0  ;;  %s602_s0 = inlined_call_operand.hbm [shape: f32[8,16], index: 0, kind: input, shape index: {}]   ;;  %s603_s1 = inlined_call_operand.vmem [shape: f32[16,32], index: 1, kind: input, shape index: {}]   ;;  %s604_s2 = inlined_call_operand.vmem [shape: f32[1,32], index: 2, kind: input, shape index: {}]   ;;  %s605_s3 = inlined_call_operand.vmem [shape: f32[32,32], index: 3, kind: input, shape index: {}]   ;;  %s606_s4 = inlined_call_operand.hbm [shape: f32[1,32], index: 4, kind: input, shape index: {}]   ;;  %s607_s5 = inlined_call_operand.vmem [shape: f32[32,8], index: 5, kind: input, shape index: {}]   ;;  %s608_s6 = inlined_call_operand.hbm [shape: f32[1,8], index: 6, kind: input, shape index: {}]   ;;  %s609_s7 = inlined_call_operand.vmem [shape: f32[1,8], index: 7, kind: input, shape index: {}]   ;;  %s610_s8 = inlined_call_operand.hbm [shape: f32[8,8], index: 8, kind: output, shape index: {}]  }
   0x1   :  { %14 = vsyncpa [#allocation6], 0 }
   0x2   :  { %15 = vsyncpa [#allocation4], 0  ;;  %s498_s27 = smov [#allocation5]   ;;  %s499_s29 = smov [#allocation2]  }
   0x3   :  { %s38_s28 = sshll.u32 %s498_s27, 4  ;;  %s22_s30 = sshll.u32 %s499_s29, 4  ;;  %s39_s28 = int_to_ptr.vmem [resolvable:$true] %s38_s28  ;;  %s23_s30 = int_to_ptr.vmem [resolvable:$true] %s22_s30 }
   0x4   :  { %s420_s9 = scalar_lea.vmem %s39_s28, 16  ;;  %s424_s10 = scalar_lea.vmem %s39_s28, 32 }
   0x5   :  { %p421_p0 = scmp.ne.s32.totalorder %s39_s28, %s420_s9  ;;  %p425_p1 = scmp.lt.s32.totalorder %s39_s28, %s39_s28 }
   0x6   :  { %p426_p2 = scmp.lt.s32.totalorder %s424_s10, %s420_s9 }
   0x8   :  { %p427_p3 = por %p426_p2, %p425_p1 }
   0xa   :  { %p428_p4 = pnand %p427_p3, %p421_p0 }
   0xc   :  { %431 = shalt.err (!%p428_p4)
}
   0xd   :  { %41 = dma.hbm_to_vmem [thread:$0]  %s606_s4, 16, %s39_s28, [#allocation6]  }
   0xe   :  { %s440_s13 = scalar_lea.vmem %s23_s30, 128  ;;  %p445_p6 = scmp.lt.s32.totalorder %s23_s30, %s23_s30 }
   0xf   :  { %p441_p5 = scmp.ne.s32.totalorder %s23_s30, %s440_s13  ;;  %p446_p7 = scmp.lt.s32.totalorder %s440_s13, %s440_s13 }
  0x11   :  { %p447_p8 = por %p446_p7, %p445_p6 }
  0x13   :  { %p448_p9 = pnand %p447_p8, %p441_p5 }
  0x15   :  { %451 = shalt.err (!%p448_p9)
}
  0x16   :  { %25 = dma.hbm_to_vmem [thread:$0]  %s602_s0, 128, %s23_s30, [#allocation3]  }
  0x17   :  { %s500_s16 = smov [#allocation7]  }
  0x18   :  { %s50_s17 = sshll.u32 %s500_s16, 4  ;;  %s51_s17 = int_to_ptr.vmem [resolvable:$true] %s50_s17 }
  0x19   :  { %s460_s18 = scalar_lea.vmem %s51_s17, 16  ;;  %s464_s19 = scalar_lea.vmem %s51_s17, 32 }
  0x1a   :  { %p461_p10 = scmp.ne.s32.totalorder %s51_s17, %s460_s18  ;;  %p465_p11 = scmp.lt.s32.totalorder %s51_s17, %s51_s17 }
  0x1b   :  { %p466_p12 = scmp.lt.s32.totalorder %s464_s19, %s460_s18 }
  0x1d   :  { %p467_p13 = por %p466_p12, %p465_p11 }
  0x1f   :  { %p468_p0 = pnand %p467_p13, %p461_p10 }
  0x21   :  { %471 = shalt.err (!%p468_p0)
}
  0x22   :  { %53 = dma.hbm_to_vmem [thread:$0]  %s608_s6, 16, %s51_s17, [#allocation6]  }
  0x23   :  { %492 = dma.done.wait [#allocation3], 128  }
  0x24   :  { %493 = vsyncadd [#allocation3], 4294967168 }
  0x25   :  { %494 = dma.done.wait [#allocation6], 32  }
  0x26   :  { %495 = vsyncadd [#allocation6], 4294967264  ;;  %v501_v0 = vmov 0.0   ;;  %vm502_vm0 = vmmov 0   ;;  %v67_v1 = vld [vmem:[%s603_s1 + $0x8] sm:$0xff]  ;;  %v66_v2 = vld [vmem:[%s603_s1] sm:$0xff] }
  0x27   :  { %373 = vmatprep.subr.mxu0 %v501_v0  ;;  %377 = vmatprep.mubr.msk.f32.mxu0 %vm502_vm0, %v501_v0  ;;  %v65_v3 = vld [vmem:[#allocation2] sm:$0xff]  ;;  %vm75_vm1 = vcmask 130048   ;;  %v153_v4 = vld [vmem:[%s605_s3 + $0x18] sm:$0xff]  ;;  %v152_v5 = vld [vmem:[%s605_s3 + $0x10] sm:$0xff]  ;;  %vm161_vm2 = vcmask 261120   ;;  %vm334_vm3 = vcmask 64512  }
  0x28   :  { %380 = vmatprep.subr.mxu1 %v501_v0  ;;  %388 = vmatprep.mubr.msk.f32.mxu1 %vm502_vm0, %v501_v0  ;;  %v151_v6 = vld [vmem:[%s605_s3 + $0x8] sm:$0xff]  ;;  %v150_v7 = vld [vmem:[%s605_s3] sm:$0xff]  ;;  %v239_v8 = vld [vmem:[%s607_s5 + $0x18] sm:$0xff] }
  0x29   :  { %374 = vmatpush3.msra.mxu0 %v67_v1  ;;  %381 = vmatpush3.msra.mxu1 %v153_v4  ;;  %v352_v9 = vld [vmem:[%s604_s2] ss:$0 sm:$0xff]  ;;  %v238_v14 = vld [vmem:[%s607_s5 + $0x10] sm:$0xff]  ;;  %v237_v15 = vld [vmem:[%s607_s5 + $0x8] sm:$0xff] }
  0x2a   :  { %375 = vmatprep.subr.mxu0 %v501_v0  ;;  %382 = vmatprep.subr.mxu1 %v501_v0  ;;  %v236_v16 = vld [vmem:[%s607_s5] sm:$0xff]  ;;  %v354_v17 = vld [vmem:[#allocation5] ss:$0 sm:$0xff]  ;;  %v356_v22 = vld [vmem:[#allocation7] ss:$0 sm:$0xff]  ;;  %s503_s5 = smov [#allocation8]  }
  0x2b   :  { %376 = vmatpush3.msra.mxu0 %v66_v2  ;;  %383 = vmatpush3.msra.mxu1 %v152_v5  ;;  %v359_v29 = vld [vmem:[%s609_s7] ss:$0 sm:$0xff]  ;;  %s342_s18 = sshll.u32 %s503_s5, 4  ;;  %s343_s18 = int_to_ptr.vmem [resolvable:$true] %s342_s18 }
  0x2c   :  { %378 = vmatmul.mubr.msk.f32.vlgmr.msra.gmra.mxu0 %vm75_vm1, %v65_v3  ;;  %391 = vmatprep.subr.mxu0 %v501_v0  ;;  %s472_s19 = scalar_lea.vmem %s343_s18, 128  ;;  %p477_p2 = scmp.lt.s32.totalorder %s343_s18, %s343_s18 }
  0x2d   :  { %399 = vmatprep.mubr.msk.f32.mxu0 %vm502_vm0, %v501_v0  ;;  %384 = vmatprep.subr.mxu1 %v501_v0  ;;  %p473_p1 = scmp.ne.s32.totalorder %s343_s18, %s472_s19  ;;  %p478_p3 = scmp.lt.s32.totalorder %s472_s19, %s472_s19 }
  0x2e   :  { %385 = vmatpush3.msra.mxu1 %v151_v6  ;;  %392 = vmatpush3.msra.mxu0 %v239_v8 }
  0x2f   :  { %386 = vmatprep.subr.mxu1 %v501_v0  ;;  %393 = vmatprep.subr.mxu0 %v501_v0  ;;  %p479_p4 = por %p478_p3, %p477_p2 }
  0x30   :  { %387 = vmatpush3.msra.mxu1 %v150_v7  ;;  %394 = vmatpush3.msra.mxu0 %v238_v14 }
  0x31   :  { %395 = vmatprep.subr.mxu0 %v501_v0  ;;  %p480_p5 = pnand %p479_p4, %p473_p1 }
  0x32   :  { %396 = vmatpush3.msra.mxu0 %v237_v15 }
  0x33   :  { %397 = vmatprep.subr.mxu0 %v501_v0 }
  0x34   :  { %398 = vmatpush3.msra.mxu0 %v236_v16 }
  0xec   :  { %v145_v10 = vpop.f32.mrf.mxu0 }
  0xed   :  { %v146_v11 = vadd.f32 %v352_v9, %v145_v10 }
  0xee   :  { %v379_v12 = vpop.f32.mrf.mxu0 }
  0xef   :  { %v149_v13 = vmax.f32 %v146_v11, 0.0 }
  0xf1   :  { %389 = vmatmul.mubr.msk.f32.vlgmr.msra.gmra.mxu1 %vm161_vm2, %v149_v13 }
 0x1b1   :  { %v231_v18 = vpop.f32.mrf.mxu1 }
 0x1b2   :  { %v232_v19 = vadd.f32 %v354_v17, %v231_v18 }
 0x1b3   :  { %v390_v20 = vpop.f32.mrf.mxu1 }
 0x1b4   :  { %v235_v21 = vmax.f32 %v232_v19, 0.0 }
 0x1b6   :  { %400 = vmatmul.mubr.msk.f32.vlgmr.msra.gmra.mxu0 %vm161_vm2, %v235_v21 }
 0x276   :  { %v316_v23 = vpop.f32.mrf.mxu0 }
 0x277   :  { %v317_v24 = vadd.f32 %v356_v22, %v316_v23 }
 0x278   :  { %v401_v25 = vpop.f32.mrf.mxu0 }
 0x279   :  { %v358_v26 = vmul.f32 -1.442695, %v317_v24 }
 0x27b   :  { %408 = vpow2.f32 %v358_v26 }
 0x288   :  { %v409_v27 = vpop.eup %408 }
 0x289   :  { %v323_v28 = vadd.f32 1.0, %v409_v27 }
 0x28b   :  { %410 = vrcp.f32 %v323_v28 }
 0x298   :  { %v411_v30 = vpop.eup %410 }
 0x299   :  { %v333_v31 = vmul.f32 %v411_v30, %v359_v29 }
 0x29b   :  { %335 = vst.msk [vmem:[#allocation8] sm:$0xff] %vm334_vm3, %v333_v31 }
 0x29c   :  { %483 = shalt.err (!%p480_p5)
}
 0x29d   :  { %345 = dma.vmem_to_hbm [thread:$0]  %s343_s18, 128, %s610_s8, [#allocation4]  }
 0x29e   :  { %496 = dma.done.wait [#allocation4], 128  }
 0x29f   :  { %497 = vsyncadd [#allocation4], 4294967168 }
 0x2a0   :  { %349 = vsyncpa [#allocation3], 1 }
 0x2a1   :  { %350 = vsyncpa [#allocation6], 1 }
 0x2a2   :  { %351 = vsyncpa [#allocation4], 1 }

</bundles_post_ra>
